<compile_context>
chip_gen: v7x
topology: tpu7x:2x2x1
jax: 0.10.0
libtpu: 0.0.40
codegen_flags: <defaults>
</compile_context>

<pallas_src>
import jax
import jax.numpy as jnp
import numpy as np
from jax.experimental import pallas as pl
from jax.experimental.pallas import tpu as pltpu


_TAPS = tuple((dy, dx) for dy in (-1, 0, 1) for dx in (-1, 0, 1))  # (ky-1, kx-1), tap-major


def _make_concat_conv3x3_kernel(H, W, cin_list, cpad):
    Cin = sum(cin_list)
    HW = H * W
    bases = [int(b) for b in np.cumsum([0] + list(cin_list))[:-1]]
    nz = len(cin_list)

    def kernel(*args):
        z_refs = args[:nz]
        w_ref, b_ref, m_ref, o_ref, xcat_ref = args[nz:nz + 5]

        # ---- in-VMEM channel concat: torch.cat(z_list, dim=1) ----------------
        # 3 wide (c_i, HW) stores into one (Cpad, HW) tile; the row offsets realize
        # the concat (no HBM concat / transpose).
        for i in range(nz):
            xcat_ref[bases[i]:bases[i] + cin_list[i], :] = z_refs[i][...]
        if cpad > Cin:
            # Zero the channel-padding rows (their weight columns are zero, but
            # uninitialized VMEM could hold NaN/Inf and 0*NaN = NaN).
            xcat_ref[Cin:cpad, :] = jnp.zeros((cpad - Cin, HW), xcat_ref.dtype)
        xcat = xcat_ref[...]                                       # (Cpad, HW)

        # ---- 9-tap im2col as roll + mask + matmul-accumulate ------------------
        # Each tap t=(dy,dx): full-width lane roll by -(dy*W+dx) (wrap/cross-row
        # leakage lands exactly on SAME-padding positions, zeroed by the mask),
        # then (Cout, Cpad) @ (Cpad, HW) accumulated in registers.  No patch
        # scratch, no masked/misaligned partial stores, no zeroing.
        acc = None
        for t, (dy, dx) in enumerate(_TAPS):
            off = dy * W + dx
            v = xcat if off == 0 else pltpu.roll(xcat, shift=(-off) % HW, axis=1)
            if (dy, dx) != (0, 0):
                v = v * m_ref[t:t + 1, :]                          # (Cpad, HW)
            part = jnp.dot(w_ref[t], v, preferred_element_type=jnp.float32)
            acc = part if acc is None else acc + part              # (Cout, HW) f32

        o_ref[...] = (acc + b_ref[...]).astype(o_ref.dtype)        # lane-dense store

    return kernel


def concat_fusion_pallas(z_list, weight, bias):
    """z_list: list of NCHW arrays (N, c_i, H, W). weight: (Cout, sum(c_i), 3, 3) in
    PyTorch OIHW layout. bias: (Cout,). Returns NCHW (N, Cout, H, W), equal to
    Conv2d(cat(z_list, dim=1)) with kernel 3, stride 1, padding 1."""
    N, _, H, W = z_list[0].shape
    HW = H * W
    cin_list = [int(z.shape[1]) for z in z_list]
    Cin = sum(cin_list)
    Cout = int(weight.shape[0])
    Cpad = -(-Cin // 8) * 8            # per-tap channel block, 8-sublane aligned
    dtype = z_list[0].dtype

    # Layout-preserving reshapes only — no transpose / concat / pad round-trips in HBM.
    z_flat = [z.reshape(N, c, HW) for z, c in zip(z_list, cin_list)]

    # OIHW -> (9, Cout, Cpad): tap-major weight blocks (t = ky*3 + kx), channel dim
    # zero-padded to Cpad so each in-kernel per-tap weight load is a whole tile.
    w_taps = jnp.transpose(weight, (2, 3, 0, 1)).reshape(9, Cout, Cin)
    if Cpad > Cin:
        w_taps = jnp.pad(w_taps, ((0, 0), (0, 0), (0, Cpad - Cin)))
    b_col = bias.reshape(Cout, 1)

    # Per-tap SAME-padding validity masks (row & col in-bounds), grid-invariant:
    # built once on host, DMA'd once via a constant index_map.
    rows = np.arange(HW) // W
    cols = np.arange(HW) % W
    masks_np = np.zeros((9, HW), np.float32)
    for t, (dy, dx) in enumerate(_TAPS):
        ok = ((rows + dy >= 0) & (rows + dy < H) &
              (cols + dx >= 0) & (cols + dx < W))
        masks_np[t] = ok.astype(np.float32)
    masks = jnp.asarray(masks_np, dtype=dtype)

    kernel = _make_concat_conv3x3_kernel(H, W, cin_list, Cpad)

    in_specs = [pl.BlockSpec((pl.Squeezed(), c, HW), lambda n: (n, 0, 0))
                for c in cin_list]
    in_specs += [
        pl.BlockSpec((9, Cout, Cpad), lambda n: (0, 0, 0)),   # weight: DMA'd once
        pl.BlockSpec((Cout, 1), lambda n: (0, 0)),            # bias:   DMA'd once
        pl.BlockSpec((9, HW), lambda n: (0, 0)),              # masks:  DMA'd once
    ]
    out_specs = pl.BlockSpec((pl.Squeezed(), Cout, HW), lambda n: (n, 0, 0))

    def _isz(a):
        return jnp.dtype(a.dtype).itemsize

    cost = pl.CostEstimate(
        flops=2 * N * HW * 9 * Cpad * Cout,
        transcendentals=0,
        bytes_accessed=(sum(N * c * HW * _isz(z) for z, c in zip(z_flat, cin_list))
                        + 9 * Cout * Cpad * _isz(w_taps)
                        + Cout * _isz(b_col)
                        + 9 * HW * _isz(masks)
                        + N * Cout * HW * jnp.dtype(dtype).itemsize),
    )

    out_flat = pl.pallas_call(
        kernel,
        out_shape=jax.ShapeDtypeStruct((N, Cout, HW), dtype),
        grid_spec=pltpu.PrefetchScalarGridSpec(
            num_scalar_prefetch=0,
            grid=(N,),
            in_specs=in_specs,
            out_specs=out_specs,
            scratch_shapes=[pltpu.VMEM((Cpad, HW), dtype)],
        ),
        compiler_params=pltpu.CompilerParams(
            dimension_semantics=("parallel",)),
        cost_estimate=cost,
    )(*z_flat, w_taps, b_col, masks)

    # TODO(synk): on single-TC chips (v5e/v6e) fold B>1 images per grid step
    # (block (B, c, HW) + dot_general over the tap/channel dim) to amortize the
    # ~0.35 us per-step overhead; keep grid=(N//B,) "parallel" so both v7x TCs are
    # fed, and add a halo'd H-tile grid axis + explicit vmem_limit_bytes before
    # per-step blocks approach v7x's 32 MiB scoped VMEM.
    return out_flat.reshape(N, Cout, H, W)


if __name__ == "__main__":
    # ConcatFusion(in_dim=4, num_fea=3): conv = Conv2d(12, 4, 3, 1, 1)
    in_dim, num_fea = 4, 3
    N, H, W = 2, 16, 16
    Cin, Cout = in_dim * num_fea, in_dim

    key = jax.random.PRNGKey(0)
    k_w, k_b, *k_z = jax.random.split(key, 2 + num_fea)

    # Deterministic synthetic parameters (Conv2d-style scale).
    fan_in = Cin * 3 * 3
    bound = 1.0 / np.sqrt(fan_in)
    weight = jax.random.uniform(k_w, (Cout, Cin, 3, 3), jnp.float32, -bound, bound)
    bias = jax.random.uniform(k_b, (Cout,), jnp.float32, -bound, bound)

    z_list = [jax.random.normal(k, (N, in_dim, H, W), jnp.float32) for k in k_z]

    out = concat_fusion_pallas(z_list, weight, bias)
    out = jax.block_until_ready(out)

    # Reference check (plain XLA conv on the concatenated input, NCHW/OIHW like PyTorch).
    z_cat = jnp.concatenate(z_list, axis=1)
    ref = jax.lax.conv_general_dilated(
        z_cat, weight, window_strides=(1, 1), padding="SAME",
        dimension_numbers=("NCHW", "OIHW", "NCHW")) + bias[None, :, None, None]
    assert out.shape == (N, Cout, H, W)
    np.testing.assert_allclose(np.asarray(out), np.asarray(ref), atol=2e-4, rtol=2e-4)

    print("KERNEL_OK")
</pallas_src>

<mosaic_0001>
module attributes {stable_mosaic.version = 11 : i64} {
  func.func @kernel(%arg0: i32, %arg1: memref<1x4x256xf32, #tpu.memory_space<vmem>>, %arg2: memref<1x4x256xf32, #tpu.memory_space<vmem>>, %arg3: memref<1x4x256xf32, #tpu.memory_space<vmem>>, %arg4: memref<9x4x16xf32, #tpu.memory_space<vmem>>, %arg5: memref<4x1xf32, #tpu.memory_space<vmem>>, %arg6: memref<9x256xf32, #tpu.memory_space<vmem>>, %arg7: memref<1x4x256xf32, #tpu.memory_space<vmem>>, %arg8: memref<16x256xf32, #tpu.memory_space<vmem>>) attributes {dimension_semantics = [#tpu.dimension_semantics<parallel>], iteration_bounds = array<i64: 2>, scalar_prefetch = 0 : i64, scratch_operands = 1 : i64, tpu.core_type = #tpu.core_type<tc>, window_params = [{transform_indices = @transform_0, window_bounds = array<i64: 1, 4, 256>}, {transform_indices = @transform_1, window_bounds = array<i64: 1, 4, 256>}, {transform_indices = @transform_2, window_bounds = array<i64: 1, 4, 256>}, {pipeline_mode = #tpu.pipeline_mode<synchronous>, transform_indices = @transform_3, window_bounds = array<i64: 9, 4, 16>}, {pipeline_mode = #tpu.pipeline_mode<synchronous>, transform_indices = @transform_4, window_bounds = array<i64: 4, 1>}, {pipeline_mode = #tpu.pipeline_mode<synchronous>, transform_indices = @transform_5, window_bounds = array<i64: 9, 256>}, {transform_indices = @transform_6, window_bounds = array<i64: 1, 4, 256>}]} {
    %c0 = arith.constant 0 : index
    %c0_0 = arith.constant 0 : index
    %c0_1 = arith.constant 0 : index
    %0 = vector.load %arg1[%c0, %c0_0, %c0_1] : memref<1x4x256xf32, #tpu.memory_space<vmem>>, vector<1x4x256xf32>
    %1 = vector.shape_cast %0 : vector<1x4x256xf32> to vector<4x256xf32>
    %c0_2 = arith.constant 0 : index
    %c0_3 = arith.constant 0 : index
    %2 = vector.load %arg8[%c0_2, %c0_3] : memref<16x256xf32, #tpu.memory_space<vmem>>, vector<4x256xf32>
    tpu.vector_store %arg8[%c0_2, %c0_3], %1 {strides = array<i32>} : memref<16x256xf32, #tpu.memory_space<vmem>>, vector<4x256xf32>,
    %c0_4 = arith.constant 0 : index
    %c0_5 = arith.constant 0 : index
    %c0_6 = arith.constant 0 : index
    %3 = vector.load %arg2[%c0_4, %c0_5, %c0_6] : memref<1x4x256xf32, #tpu.memory_space<vmem>>, vector<1x4x256xf32>
    %4 = vector.shape_cast %3 : vector<1x4x256xf32> to vector<4x256xf32>
    %c4 = arith.constant 4 : index
    %c0_7 = arith.constant 0 : index
    %5 = vector.load %arg8[%c4, %c0_7] : memref<16x256xf32, #tpu.memory_space<vmem>>, vector<4x256xf32>
    tpu.vector_store %arg8[%c4, %c0_7], %4 {strides = array<i32>} : memref<16x256xf32, #tpu.memory_space<vmem>>, vector<4x256xf32>,
    %c0_8 = arith.constant 0 : index
    %c0_9 = arith.constant 0 : index
    %c0_10 = arith.constant 0 : index
    %6 = vector.load %arg3[%c0_8, %c0_9, %c0_10] : memref<1x4x256xf32, #tpu.memory_space<vmem>>, vector<1x4x256xf32>
    %7 = vector.shape_cast %6 : vector<1x4x256xf32> to vector<4x256xf32>
    %c8 = arith.constant 8 : index
    %c0_11 = arith.constant 0 : index
    %8 = vector.load %arg8[%c8, %c0_11] : memref<16x256xf32, #tpu.memory_space<vmem>>, vector<4x256xf32>
    tpu.vector_store %arg8[%c8, %c0_11], %7 {strides = array<i32>} : memref<16x256xf32, #tpu.memory_space<vmem>>, vector<4x256xf32>,
    %cst = arith.constant 0.000000e+00 : f32
    %9 = vector.broadcast %cst : f32 to vector<4x256xf32>
    %c12 = arith.constant 12 : index
    %c0_12 = arith.constant 0 : index
    %10 = vector.load %arg8[%c12, %c0_12] : memref<16x256xf32, #tpu.memory_space<vmem>>, vector<4x256xf32>
    tpu.vector_store %arg8[%c12, %c0_12], %9 {strides = array<i32>} : memref<16x256xf32, #tpu.memory_space<vmem>>, vector<4x256xf32>,
    %c0_13 = arith.constant 0 : index
    %c0_14 = arith.constant 0 : index
    %11 = vector.load %arg8[%c0_13, %c0_14] : memref<16x256xf32, #tpu.memory_space<vmem>>, vector<16x256xf32>
    %c17_i32 = arith.constant 17 : i32
    %12 = tpu.dynamic_rotate %11 by %c17_i32 dim 1 : vector<16x256xf32>, i32 -> vector<16x256xf32>
    %c0_15 = arith.constant 0 : index
    %c0_16 = arith.constant 0 : index
    %13 = vector.load %arg6[%c0_15, %c0_16] : memref<9x256xf32, #tpu.memory_space<vmem>>, vector<1x256xf32>
    %14 = vector.broadcast %13 : vector<1x256xf32> to vector<16x256xf32>
    %15 = arith.mulf %12, %14 : vector<16x256xf32>
    %c0_17 = arith.constant 0 : index
    %c0_18 = arith.constant 0 : index
    %c0_19 = arith.constant 0 : index
    %16 = vector.load %arg4[%c0_17, %c0_18, %c0_19] : memref<9x4x16xf32, #tpu.memory_space<vmem>>, vector<1x4x16xf32>
    %17 = vector.shape_cast %16 : vector<1x4x16xf32> to vector<4x16xf32>
    %cst_20 = arith.constant dense<0.000000e+00> : vector<4x256xf32>
    %18 = tpu.matmul %17, %15, %cst_20 {dimension_numbers = #tpu.dot_dimension_numbers<[1], [0], [0], [1], [0, 0, 1, 1], [], []>} : vector<4x16xf32>, vector<16x256xf32>, vector<4x256xf32> -> vector<4x256xf32>
    %c16_i32 = arith.constant 16 : i32
    %19 = tpu.dynamic_rotate %11 by %c16_i32 dim 1 : vector<16x256xf32>, i32 -> vector<16x256xf32>
    %c1 = arith.constant 1 : index
    %c0_21 = arith.constant 0 : index
    %20 = vector.load %arg6[%c1, %c0_21] : memref<9x256xf32, #tpu.memory_space<vmem>>, vector<1x256xf32>
    %21 = vector.broadcast %20 : vector<1x256xf32> to vector<16x256xf32>
    %22 = arith.mulf %19, %21 : vector<16x256xf32>
    %c1_22 = arith.constant 1 : index
    %c0_23 = arith.constant 0 : index
    %c0_24 = arith.constant 0 : index
    %23 = vector.load %arg4[%c1_22, %c0_23, %c0_24] : memref<9x4x16xf32, #tpu.memory_space<vmem>>, vector<1x4x16xf32>
    %24 = vector.shape_cast %23 : vector<1x4x16xf32> to vector<4x16xf32>
    %cst_25 = arith.constant dense<0.000000e+00> : vector<4x256xf32>
    %25 = tpu.matmul %24, %22, %cst_25 {dimension_numbers = #tpu.dot_dimension_numbers<[1], [0], [0], [1], [0, 0, 1, 1], [], []>} : vector<4x16xf32>, vector<16x256xf32>, vector<4x256xf32> -> vector<4x256xf32>
    %26 = arith.addf %18, %25 : vector<4x256xf32>
    %c15_i32 = arith.constant 15 : i32
    %27 = tpu.dynamic_rotate %11 by %c15_i32 dim 1 : vector<16x256xf32>, i32 -> vector<16x256xf32>
    %c2 = arith.constant 2 : index
    %c0_26 = arith.constant 0 : index
    %28 = vector.load %arg6[%c2, %c0_26] : memref<9x256xf32, #tpu.memory_space<vmem>>, vector<1x256xf32>
    %29 = vector.broadcast %28 : vector<1x256xf32> to vector<16x256xf32>
    %30 = arith.mulf %27, %29 : vector<16x256xf32>
    %c2_27 = arith.constant 2 : index
    %c0_28 = arith.constant 0 : index
    %c0_29 = arith.constant 0 : index
    %31 = vector.load %arg4[%c2_27, %c0_28, %c0_29] : memref<9x4x16xf32, #tpu.memory_space<vmem>>, vector<1x4x16xf32>
    %32 = vector.shape_cast %31 : vector<1x4x16xf32> to vector<4x16xf32>
    %cst_30 = arith.constant dense<0.000000e+00> : vector<4x256xf32>
    %33 = tpu.matmul %32, %30, %cst_30 {dimension_numbers = #tpu.dot_dimension_numbers<[1], [0], [0], [1], [0, 0, 1, 1], [], []>} : vector<4x16xf32>, vector<16x256xf32>, vector<4x256xf32> -> vector<4x256xf32>
    %34 = arith.addf %26, %33 : vector<4x256xf32>
    %c1_i32 = arith.constant 1 : i32
    %35 = tpu.dynamic_rotate %11 by %c1_i32 dim 1 : vector<16x256xf32>, i32 -> vector<16x256xf32>
    %c3 = arith.constant 3 : index
    %c0_31 = arith.constant 0 : index
    %36 = vector.load %arg6[%c3, %c0_31] : memref<9x256xf32, #tpu.memory_space<vmem>>, vector<1x256xf32>
    %37 = vector.broadcast %36 : vector<1x256xf32> to vector<16x256xf32>
    %38 = arith.mulf %35, %37 : vector<16x256xf32>
    %c3_32 = arith.constant 3 : index
    %c0_33 = arith.constant 0 : index
    %c0_34 = arith.constant 0 : index
    %39 = vector.load %arg4[%c3_32, %c0_33, %c0_34] : memref<9x4x16xf32, #tpu.memory_space<vmem>>, vector<1x4x16xf32>
    %40 = vector.shape_cast %39 : vector<1x4x16xf32> to vector<4x16xf32>
    %cst_35 = arith.constant dense<0.000000e+00> : vector<4x256xf32>
    %41 = tpu.matmul %40, %38, %cst_35 {dimension_numbers = #tpu.dot_dimension_numbers<[1], [0], [0], [1], [0, 0, 1, 1], [], []>} : vector<4x16xf32>, vector<16x256xf32>, vector<4x256xf32> -> vector<4x256xf32>
    %42 = arith.addf %34, %41 : vector<4x256xf32>
    %c4_36 = arith.constant 4 : index
    %c0_37 = arith.constant 0 : index
    %c0_38 = arith.constant 0 : index
    %43 = vector.load %arg4[%c4_36, %c0_37, %c0_38] : memref<9x4x16xf32, #tpu.memory_space<vmem>>, vector<1x4x16xf32>
    %44 = vector.shape_cast %43 : vector<1x4x16xf32> to vector<4x16xf32>
    %cst_39 = arith.constant dense<0.000000e+00> : vector<4x256xf32>
    %45 = tpu.matmul %44, %11, %cst_39 {dimension_numbers = #tpu.dot_dimension_numbers<[1], [0], [0], [1], [0, 0, 1, 1], [], []>} : vector<4x16xf32>, vector<16x256xf32>, vector<4x256xf32> -> vector<4x256xf32>
    %46 = arith.addf %42, %45 : vector<4x256xf32>
    %c255_i32 = arith.constant 255 : i32
    %47 = tpu.dynamic_rotate %11 by %c255_i32 dim 1 : vector<16x256xf32>, i32 -> vector<16x256xf32>
    %c5 = arith.constant 5 : index
    %c0_40 = arith.constant 0 : index
    %48 = vector.load %arg6[%c5, %c0_40] : memref<9x256xf32, #tpu.memory_space<vmem>>, vector<1x256xf32>
    %49 = vector.broadcast %48 : vector<1x256xf32> to vector<16x256xf32>
    %50 = arith.mulf %47, %49 : vector<16x256xf32>
    %c5_41 = arith.constant 5 : index
    %c0_42 = arith.constant 0 : index
    %c0_43 = arith.constant 0 : index
    %51 = vector.load %arg4[%c5_41, %c0_42, %c0_43] : memref<9x4x16xf32, #tpu.memory_space<vmem>>, vector<1x4x16xf32>
    %52 = vector.shape_cast %51 : vector<1x4x16xf32> to vector<4x16xf32>
    %cst_44 = arith.constant dense<0.000000e+00> : vector<4x256xf32>
    %53 = tpu.matmul %52, %50, %cst_44 {dimension_numbers = #tpu.dot_dimension_numbers<[1], [0], [0], [1], [0, 0, 1, 1], [], []>} : vector<4x16xf32>, vector<16x256xf32>, vector<4x256xf32> -> vector<4x256xf32>
    %54 = arith.addf %46, %53 : vector<4x256xf32>
    %c241_i32 = arith.constant 241 : i32
    %55 = tpu.dynamic_rotate %11 by %c241_i32 dim 1 : vector<16x256xf32>, i32 -> vector<16x256xf32>
    %c6 = arith.constant 6 : index
    %c0_45 = arith.constant 0 : index
    %56 = vector.load %arg6[%c6, %c0_45] : memref<9x256xf32, #tpu.memory_space<vmem>>, vector<1x256xf32>
    %57 = vector.broadcast %56 : vector<1x256xf32> to vector<16x256xf32>
    %58 = arith.mulf %55, %57 : vector<16x256xf32>
    %c6_46 = arith.constant 6 : index
    %c0_47 = arith.constant 0 : index
    %c0_48 = arith.constant 0 : index
    %59 = vector.load %arg4[%c6_46, %c0_47, %c0_48] : memref<9x4x16xf32, #tpu.memory_space<vmem>>, vector<1x4x16xf32>
    %60 = vector.shape_cast %59 : vector<1x4x16xf32> to vector<4x16xf32>
    %cst_49 = arith.constant dense<0.000000e+00> : vector<4x256xf32>
    %61 = tpu.matmul %60, %58, %cst_49 {dimension_numbers = #tpu.dot_dimension_numbers<[1], [0], [0], [1], [0, 0, 1, 1], [], []>} : vector<4x16xf32>, vector<16x256xf32>, vector<4x256xf32> -> vector<4x256xf32>
    %62 = arith.addf %54, %61 : vector<4x256xf32>
    %c240_i32 = arith.constant 240 : i32
    %63 = tpu.dynamic_rotate %11 by %c240_i32 dim 1 : vector<16x256xf32>, i32 -> vector<16x256xf32>
    %c7 = arith.constant 7 : index
    %c0_50 = arith.constant 0 : index
    %64 = vector.load %arg6[%c7, %c0_50] : memref<9x256xf32, #tpu.memory_space<vmem>>, vector<1x256xf32>
    %65 = vector.broadcast %64 : vector<1x256xf32> to vector<16x256xf32>
    %66 = arith.mulf %63, %65 : vector<16x256xf32>
    %c7_51 = arith.constant 7 : index
    %c0_52 = arith.constant 0 : index
    %c0_53 = arith.constant 0 : index
    %67 = vector.load %arg4[%c7_51, %c0_52, %c0_53] : memref<9x4x16xf32, #tpu.memory_space<vmem>>, vector<1x4x16xf32>
    %68 = vector.shape_cast %67 : vector<1x4x16xf32> to vector<4x16xf32>
    %cst_54 = arith.constant dense<0.000000e+00> : vector<4x256xf32>
    %69 = tpu.matmul %68, %66, %cst_54 {dimension_numbers = #tpu.dot_dimension_numbers<[1], [0], [0], [1], [0, 0, 1, 1], [], []>} : vector<4x16xf32>, vector<16x256xf32>, vector<4x256xf32> -> vector<4x256xf32>
    %70 = arith.addf %62, %69 : vector<4x256xf32>
    %c239_i32 = arith.constant 239 : i32
    %71 = tpu.dynamic_rotate %11 by %c239_i32 dim 1 : vector<16x256xf32>, i32 -> vector<16x256xf32>
    %c8_55 = arith.constant 8 : index
    %c0_56 = arith.constant 0 : index
    %72 = vector.load %arg6[%c8_55, %c0_56] : memref<9x256xf32, #tpu.memory_space<vmem>>, vector<1x256xf32>
    %73 = vector.broadcast %72 : vector<1x256xf32> to vector<16x256xf32>
    %74 = arith.mulf %71, %73 : vector<16x256xf32>
    %c8_57 = arith.constant 8 : index
    %c0_58 = arith.constant 0 : index
    %c0_59 = arith.constant 0 : index
    %75 = vector.load %arg4[%c8_57, %c0_58, %c0_59] : memref<9x4x16xf32, #tpu.memory_space<vmem>>, vector<1x4x16xf32>
    %76 = vector.shape_cast %75 : vector<1x4x16xf32> to vector<4x16xf32>
    %cst_60 = arith.constant dense<0.000000e+00> : vector<4x256xf32>
    %77 = tpu.matmul %76, %74, %cst_60 {dimension_numbers = #tpu.dot_dimension_numbers<[1], [0], [0], [1], [0, 0, 1, 1], [], []>} : vector<4x16xf32>, vector<16x256xf32>, vector<4x256xf32> -> vector<4x256xf32>
    %78 = arith.addf %70, %77 : vector<4x256xf32>
    %c0_61 = arith.constant 0 : index
    %c0_62 = arith.constant 0 : index
    %79 = vector.load %arg5[%c0_61, %c0_62] : memref<4x1xf32, #tpu.memory_space<vmem>>, vector<4x1xf32>
    %80 = vector.broadcast %79 : vector<4x1xf32> to vector<4x256xf32>
    %81 = arith.addf %78, %80 : vector<4x256xf32>
    %c0_63 = arith.constant 0 : index
    %c0_64 = arith.constant 0 : index
    %c0_65 = arith.constant 0 : index
    %82 = vector.load %arg7[%c0_63, %c0_64, %c0_65] : memref<1x4x256xf32, #tpu.memory_space<vmem>>, vector<1x4x256xf32>
    %83 = vector.shape_cast %82 : vector<1x4x256xf32> to vector<4x256xf32>
    %84 = vector.shape_cast %81 : vector<4x256xf32> to vector<1x4x256xf32>
    tpu.vector_store %arg7[%c0_63, %c0_64, %c0_65], %84 {strides = array<i32>} : memref<1x4x256xf32, #tpu.memory_space<vmem>>, vector<1x4x256xf32>,
    return
  }
  func.func @transform_0(%arg0: i32) -> (i32, i32, i32) {
    %c0_i32 = arith.constant 0 : i32
    %c0_i32_0 = arith.constant 0 : i32
    %c0_i32_1 = arith.constant 0 : i32
    return %arg0, %c0_i32, %c0_i32_0 : i32, i32, i32
  }
  func.func @transform_1(%arg0: i32) -> (i32, i32, i32) {
    %c0_i32 = arith.constant 0 : i32
    %c0_i32_0 = arith.constant 0 : i32
    %c0_i32_1 = arith.constant 0 : i32
    return %arg0, %c0_i32, %c0_i32_0 : i32, i32, i32
  }
  func.func @transform_2(%arg0: i32) -> (i32, i32, i32) {
    %c0_i32 = arith.constant 0 : i32
    %c0_i32_0 = arith.constant 0 : i32
    %c0_i32_1 = arith.constant 0 : i32
    return %arg0, %c0_i32, %c0_i32_0 : i32, i32, i32
  }
  func.func @transform_3(%arg0: i32) -> (i32, i32, i32) {
    %c0_i32 = arith.constant 0 : i32
    %c0_i32_0 = arith.constant 0 : i32
    %c0_i32_1 = arith.constant 0 : i32
    %c0_i32_2 = arith.constant 0 : i32
    return %c0_i32, %c0_i32_0, %c0_i32_1 : i32, i32, i32
  }
  func.func @transform_4(%arg0: i32) -> (i32, i32) {
    %c0_i32 = arith.constant 0 : i32
    %c0_i32_0 = arith.constant 0 : i32
    %c0_i32_1 = arith.constant 0 : i32
    return %c0_i32, %c0_i32_0 : i32, i32
  }
  func.func @transform_5(%arg0: i32) -> (i32, i32) {
    %c0_i32 = arith.constant 0 : i32
    %c0_i32_0 = arith.constant 0 : i32
    %c0_i32_1 = arith.constant 0 : i32
    return %c0_i32, %c0_i32_0 : i32, i32
  }
  func.func @transform_6(%arg0: i32) -> (i32, i32, i32) {
    %c0_i32 = arith.constant 0 : i32
    %c0_i32_0 = arith.constant 0 : i32
    %c0_i32_1 = arith.constant 0 : i32
    return %arg0, %c0_i32, %c0_i32_0 : i32, i32, i32
  }
}

</mosaic_0001>

<bundles_post_ra>
// kernel: tpu_custom_call.1
= control target key start
LH: loop header
LB: loop body
LE: loop exit
PB: predicated region body
PF: predicated region fallthrough
CT: control target
= control target key end

     0   :  { %s2323_s0 = inlined_call_operand.hbm [shape: f32[2,4,256], index: 0, kind: input, shape index: {}]   ;;  %s2324_s1 = inlined_call_operand.hbm [shape: f32[2,4,256], index: 1, kind: input, shape index: {}]   ;;  %s2325_s2 = inlined_call_operand.hbm [shape: f32[2,4,256], index: 2, kind: input, shape index: {}]   ;;  %s2326_s3 = inlined_call_operand.hbm [shape: f32[9,4,16], index: 3, kind: input, shape index: {}]   ;;  %s2327_s4 = inlined_call_operand.vmem [shape: f32[4,1], index: 4, kind: input, shape index: {}]   ;;  %s2328_s5 = inlined_call_operand.hbm [shape: f32[9,256], index: 5, kind: input, shape index: {}]   ;;  %s2329_s6 = inlined_call_operand.hbm [shape: f32[2,4,256], index: 6, kind: output, shape index: {}]  }
   0x1   :  { %2346 = sst [smem:[#allocation21_spill]] %s2324_s1 }
   0x2   :  { %2347 = sst [smem:[#allocation22_spill]] %s2326_s3 }
   0x3   :  { %11 = vsyncpa [#allocation4], 0 }
   0x4   :  { %13 = vsyncpa [#allocation4 + $0x1], 0 }
   0x5   :  { %14 = vsyncpa [#allocation7], 0 }
   0x6   :  { %16 = vsyncpa [#allocation7 + $0x1], 0 }
   0x7   :  { %17 = vsyncpa [#allocation10], 0 }
   0x8   :  { %18 = vsyncpa [#allocation5], 0 }
   0x9   :  { %20 = vsyncpa [#allocation5 + $0x1], 0  ;;  %s1956_s21 = smov 0   ;;  %s1958_s22 = smov 0  }
   0xa   :  { %s1960_s23 = smov 0   ;;  %s1962_s24 = smov 0  }
   0xb LB: > { %2348 = sst [smem:[#allocation17_spill]] %s1899_s24  ;;  %s1977_s25 = sadd.s32 4294967295, %s1899_s24   ;;  %s1899_s24 = sphi %s1962_s24, %s2378_s24   ;;  %s1895_s23 = sphi %s1960_s23, %s2382_s23   ;;  %s1891_s22 = sphi %s1958_s22, %s2381_s22   ;;  %s1887_s21 = sphi %s1956_s21, %s2380_s21  }
   0xc   : > { %s1493_s26 = sadd.s32 4294967294, %s1899_s24   ;;  %p46_p0 = scmp.ne.s32.totalorder %s1891_s22, %s1887_s21 }
   0xd   : > { %p2330_p1 = scmp.eq.s32.totalorder %s1977_s25, 0  ;;  %p191_p3 = scmp.eq.s32.totalorder %s1493_s26, 1 }
   0xe   : > { %p1494_p5 = scmp.ge.s32.totalorder %s1899_s24, 1  ;;  %p198_p7 = scmp.lt.s32.totalorder %s1899_s24, 3 }
   0xf   : > { %p1986_p4 = por %p2330_p1, %p46_p0  ;;  %p1991_p6 = por %p191_p3, %p46_p0 }
  0x10   : > { %p1996_p8 = pnand %p1494_p5, %p198_p7  ;;  %s1901_s30 = smov [#allocation9]  }
  0x11   : > { %s2349_s27 = scalar_select %p1986_p4, 1, 0 }
  0x12   : > { %s2350_s28 = scalar_select %p1991_p6, 1, 0 }
  0x13   : > { %s2352_s29 = scalar_select %p1996_p8, 1, 0 }
  0x14   : > { %2351 = sst [smem:[#allocation18_spill]] %s2350_s28  ;;  %s210_s7 = sshll.u32 %s1901_s30, 4  ;;  %s2000_s7 = int_to_ptr.vmem [resolvable:$true] %s210_s7 }
  0x15   : > { %p1600_p9 = pneg %p1996_p8  ;;  %s2012_s9 = sadd.s32 1, %s1899_s24  }
  0x16   : > { %2354 = sst [smem:[#allocation19_spill]] %s2012_s9  ;;  %s33_s10 = sadd.s32 1, %s1895_s23 }
  0x17   : > { %p2007_p11 = pnand %p1600_p9, %p2330_p1  ;;  %s30_s11 = ssub.s32 %s1899_s24, %s2012_s9 }
  0x18   : > { %s2355_s3 = sld [smem:[#allocation22_spill]] }
  0x19   : > { %s2353_s8 = scalar_select %p2007_p11, 1, 0 }
  0x1a   : > { %p2332_p13 = pneg %p2007_p11 }
  0x1e   : > { %s1679_s14 = scalar_lea.hbm %s2355_s3, 576 }
  0x1f   : > { %p1680_p12 = scmp.ne.s32.totalorder %s2355_s3, %s1679_s14  ;;  %p1686_p5 = scmp.lt.u32.totalorder %s1679_s14, %s2355_s3 }
  0x21   : > { %p1682_p0 = pnand %p2332_p13, %p1680_p12 }
  0x23   : > { %p1683_p3 = pneg %p1682_p0 }
  0x25   : > { %p1688_p7 = pnand %p1686_p5, %p1683_p3 }
  0x27   : > { %1691 = shalt.err (!%p1688_p7)
}
  0x28   : > { %s1692_s19 = scalar_lea.vmem %s2000_s7, 576  ;;  %p1700_p2 = scmp.lt.s32.totalorder %s2000_s7, %s2000_s7 }
  0x29   : > { %p1693_p9 = scmp.ne.s32.totalorder %s2000_s7, %s1692_s19  ;;  %p1701_p12 = scmp.lt.s32.totalorder %s1692_s19, %s1692_s19 }
  0x2b   : > { %p1695_p10 = pnand %p1693_p9, %p2332_p13  ;;  %p1702_p0 = por %p1701_p12, %p1700_p2 }
  0x2d   : > { %p1696_p1 = pneg %p1695_p10 }
  0x2f   : > { %p1703_p6 = pnand %p1702_p0, %p1696_p1 }
  0x31   : > { %1706 = shalt.err (!%p1703_p6)
}
  0x32   : > { %s1902_s20 = smov 64   ;;  %s1903_s26 = smov 4  }
  0x33   : > { %1603 = dma.hbm_to_vmem [thread:$0]  (!%p2007_p11), %s2355_s3, 576, %s2000_s7, [#allocation10], %s1902_s20, %s1902_s20, %s1903_s26  }
  0x34   : > { %p31_p1 = scmp.eq.s32.totalorder %s30_s11, 0  ;;  %p40_p2 = scmp.ne.s32.totalorder %s1895_s23, %s1891_s22 }
  0x35   : > { %p41_p6 = scmp.eq.s32.totalorder %s1899_s24, 0  ;;  %p1623_p10 = scmp.lt.s32.totalorder %s1899_s24, 2 }
  0x36   : > { %s2049_s13 = scalar_select %p31_p1, %s1895_s23, %s33_s10  }
  0x37   : > { %p42_p3 = por %p41_p6, %p40_p2  ;;  %p2357_p5 = scmp.eq.s32.totalorder %s1977_s25, 1 }
  0x38   : > { %2356 = sst [smem:[#allocation20_spill]] %s2049_s13  ;;  %s2331_s15 = sand.u32 1, %s1895_s23  }
  0x39   : > { %p2053_p7 = por %p2357_p5, %p40_p2  ;;  %s2059_s16 = sshll.u32 %s1899_s24, 7 }
  0x3a   : > { %s2063_s17 = sshll.u32 %s2331_s15, 3  ;;  %p2065_p9 = pnand %p1623_p10, %p42_p3 }
  0x3b   : > { %s2358_s14 = scalar_select %p2053_p7, 1, 0 }
  0x3c   : > { %s2359_s7 = scalar_select %p2065_p9, 1, 0 }
  0x3d   : > { %s259_s10 = sand.u32 1, %s1899_s24   ;;  %s2360_s1 = sld [smem:[#allocation21_spill]] }
  0x3e   : > { %s263_s20 = scalar_lea.vmem [#allocation6], %s2063_s17  ;;  %s2079_s30 = scalar_lea.sflag [#allocation7], %s259_s10 }
  0x3f   : > { %s271_s26 = sshll.u32 %s263_s20, 4  ;;  %p2085_p0 = pneg %p2065_p9  ;;  %s2077_s26 = int_to_ptr.vmem [resolvable:$true] %s271_s26 }
  0x41   : > { %s2361_s15 = scalar_select %p2085_p0, 1, 0 }
  0x43   : > { %s2074_s19 = scalar_lea.hbm %s2360_s1, %s2059_s16  ;;  %s1712_s3 = scalar_lea.hbm %s2360_s1, 256 }
  0x44   : > { %s1707_s12 = scalar_lea.hbm %s2074_s19, 128  ;;  %p1713_p6 = scmp.lt.u32.totalorder %s2074_s19, %s2360_s1 }
  0x45   : > { %p1708_p12 = scmp.ne.s32.totalorder %s2074_s19, %s1707_s12  ;;  %p1714_p10 = scmp.lt.u32.totalorder %s1712_s3, %s1707_s12 }
  0x46   : > { %p1716_p5 = scmp.lt.u32.totalorder %s1707_s12, %s2074_s19 }
  0x47   : > { %p1710_p1 = pnand %p2085_p0, %p1708_p12  ;;  %p1715_p3 = por %p1714_p10, %p1713_p6 }
  0x49   : > { %p1711_p2 = pneg %p1710_p1  ;;  %p1717_p13 = por %p1716_p5, %p1715_p3 }
  0x4b   : > { %p1718_p7 = pnand %p1717_p13, %p1711_p2 }
  0x4d   : > { %1721 = shalt.err (!%p1718_p7)
}
  0x4e   : > { %s1722_s10 = scalar_lea.vmem %s2077_s26, 128  ;;  %s1904_s11 = smov [#allocation6]  }
  0x4f   : > { %p1723_p12 = scmp.ne.s32.totalorder %s2077_s26, %s1722_s10  ;;  %s1727_s18 = sshll.u32 %s1904_s11, 4  ;;  %s1728_s18 = int_to_ptr.vmem [resolvable:$false] %s1727_s18 }
  0x50   : > { %s1729_s13 = scalar_lea.vmem %s1728_s18, 256  ;;  %p1730_p8 = scmp.lt.s32.totalorder %s2077_s26, %s1728_s18 }
  0x51   : > { %p1725_p1 = pnand %p1723_p12, %p2085_p0  ;;  %p1731_p11 = scmp.lt.s32.totalorder %s1729_s13, %s1722_s10 }
  0x53   : > { %p1726_p4 = pneg %p1725_p1  ;;  %p1732_p6 = por %p1731_p11, %p1730_p8 }
  0x55   : > { %p1733_p10 = pnand %p1732_p6, %p1726_p4 }
  0x57   : > { %1736 = shalt.err (!%p1733_p10)
}
  0x58   : > { %1613 = dma.hbm_to_vmem [thread:$0]  (!%p2065_p9), %s2074_s19, 128, %s2077_s26, %s2079_s30  }
  0x59   : > { %s1905_s3 = smov [#allocation11]   ;;  %s1737_s11 = scalar_lea.hbm %s2328_s5, 512 }
  0x5a   : > { %s226_s12 = sshll.u32 %s1905_s3, 4  ;;  %p1738_p8 = scmp.ne.s32.totalorder %s2328_s5, %s1737_s11  ;;  %s227_s12 = int_to_ptr.vmem [resolvable:$true] %s226_s12 }
  0x5b   : > { %p2362_p4 = scmp.ne.s32.totalorder %s2353_s8, 0  ;;  %p1744_p2 = scmp.lt.u32.totalorder %s1737_s11, %s2328_s5 }
  0x5d   : > { %p2363_p11 = pneg %p2362_p4 }
  0x5f   : > { %p1740_p13 = pnand %p1738_p8, %p2363_p11 }
  0x61   : > { %p1741_p7 = pneg %p1740_p13 }
  0x63   : > { %p1746_p3 = pnand %p1744_p2, %p1741_p7 }
  0x65   : > { %1749 = shalt.err (!%p1746_p3)
}
  0x66   : > { %s1750_s19 = scalar_lea.vmem %s227_s12, 512  ;;  %p2364_p12 = pmov %p2363_p11 }
  0x67   : > { %p1751_p5 = scmp.ne.s32.totalorder %s227_s12, %s1750_s19  ;;  %p1758_p10 = scmp.lt.s32.totalorder %s227_s12, %s227_s12 }
  0x68   : > { %p1759_p9 = scmp.lt.s32.totalorder %s1750_s19, %s1750_s19 }
  0x69   : > { %p1753_p1 = pnand %p1751_p5, %p2364_p12 }
  0x6a   : > { %p1760_p0 = por %p1759_p9, %p1758_p10 }
  0x6b   : > { %p1754_p6 = pneg %p1753_p1 }
  0x6d   : > { %p1761_p8 = pnand %p1760_p0, %p1754_p6 }
  0x6f   : > { %1764 = shalt.err (!%p1761_p8)
}
  0x70   : > { %s1906_s1 = smov 256   ;;  %s1907_s9 = smov 16  }
  0x71   : > { %1606 = dma.hbm_to_vmem [thread:$0]  (!%p2362_p4), %s2328_s5, 512, %s227_s12, [#allocation10], %s1906_s1, %s1906_s1, %s1907_s9  }
  0x72   : > { %s2133_s18 = scalar_lea.hbm %s2323_s0, %s2059_s16  ;;  %s244_s10 = scalar_lea.vmem [#allocation3], %s2063_s17 }
  0x73   : > { %s252_s13 = sshll.u32 %s244_s10, 4  ;;  %s2365_s19 = sand.u32 1, %s1895_s23   ;;  %s253_s13 = int_to_ptr.vmem [resolvable:$true] %s252_s13 }
  0x74   : > { %s241_s24 = scalar_lea.sflag [#allocation4], %s2365_s19  ;;  %s1765_s28 = scalar_lea.hbm %s2133_s18, 128 }
  0x75   : > { %p1766_p9 = scmp.ne.s32.totalorder %s2133_s18, %s1765_s28  ;;  %p2366_p0 = scmp.ne.s32.totalorder %s2361_s15, 0 }
  0x76   : > { %s1770_s1 = scalar_lea.hbm %s2323_s0, 256  ;;  %p1771_p4 = scmp.lt.u32.totalorder %s2133_s18, %s2323_s0 }
  0x77   : > { %p1768_p11 = pnand %p1766_p9, %p2366_p0  ;;  %p1772_p7 = scmp.lt.u32.totalorder %s1770_s1, %s1765_s28 }
  0x78   : > { %p1774_p3 = scmp.lt.u32.totalorder %s1765_s28, %s2133_s18 }
  0x79   : > { %p1769_p13 = pneg %p1768_p11  ;;  %p1773_p2 = por %p1772_p7, %p1771_p4 }
  0x7b   : > { %p1775_p5 = por %p1774_p3, %p1773_p2 }
  0x7d   : > { %p1776_p12 = pnand %p1775_p5, %p1769_p13 }
  0x7f   : > { %1779 = shalt.err (!%p1776_p12)
}
  0x80   : > { %s1780_s3 = scalar_lea.vmem %s253_s13, 128  ;;  %s1908_s20 = smov [#allocation3]  }
  0x81   : > { %p1781_p1 = scmp.ne.s32.totalorder %s253_s13, %s1780_s3  ;;  %s1785_s11 = sshll.u32 %s1908_s20, 4  ;;  %s1786_s11 = int_to_ptr.vmem [resolvable:$false] %s1785_s11 }
  0x82   : > { %s1787_s10 = scalar_lea.vmem %s1786_s11, 256  ;;  %p1788_p8 = scmp.lt.s32.totalorder %s253_s13, %s1786_s11 }
  0x83   : > { %p1783_p6 = pnand %p1781_p1, %p2366_p0  ;;  %p1789_p9 = scmp.lt.s32.totalorder %s1787_s10, %s1780_s3 }
  0x85   : > { %p1784_p10 = pneg %p1783_p6  ;;  %p1790_p11 = por %p1789_p9, %p1788_p8 }
  0x87   : > { %p1791_p4 = pnand %p1790_p11, %p1784_p10 }
  0x89   : > { %1794 = shalt.err (!%p1791_p4)
}
  0x8a   : > { %p2367_p7 = scmp.ne.s32.totalorder %s2359_s7, 0  ;;  %s2159_s8 = scalar_lea.hbm %s2325_s2, %s2059_s16 }
  0x8b   : > { %s282_s12 = scalar_lea.vmem [#allocation8], %s2063_s17  ;;  %s1795_s9 = scalar_lea.hbm %s2159_s8, 128 }
  0x8c   : > { %1610 = dma.hbm_to_vmem [thread:$0]  (!%p2367_p7), %s2133_s18, 128, %s253_s13, %s241_s24  }
  0x8d   : > { %s290_s1 = sshll.u32 %s282_s12, 4  ;;  %p1796_p13 = scmp.ne.s32.totalorder %s2159_s8, %s1795_s9  ;;  %s291_s1 = int_to_ptr.vmem [resolvable:$true] %s290_s1 }
  0x8e   : > { %s1800_s24 = scalar_lea.hbm %s2325_s2, 256  ;;  %p1801_p5 = scmp.lt.u32.totalorder %s2159_s8, %s2325_s2 }
  0x8f   : > { %p1798_p2 = pnand %p1796_p13, %p2366_p0  ;;  %p1802_p12 = scmp.lt.u32.totalorder %s1800_s24, %s1795_s9 }
  0x90   : > { %p1804_p6 = scmp.lt.u32.totalorder %s1795_s9, %s2159_s8 }
  0x91   : > { %p1799_p3 = pneg %p1798_p2  ;;  %p1803_p1 = por %p1802_p12, %p1801_p5 }
  0x93   : > { %p1805_p10 = por %p1804_p6, %p1803_p1 }
  0x95   : > { %p1806_p8 = pnand %p1805_p10, %p1799_p3 }
  0x97   : > { %1809 = shalt.err (!%p1806_p8)
}
  0x98   : > { %s1810_s16 = scalar_lea.vmem %s291_s1, 128  ;;  %s1909_s17 = smov [#allocation8]  }
  0x99   : > { %p1811_p9 = scmp.ne.s32.totalorder %s291_s1, %s1810_s16  ;;  %s1815_s20 = sshll.u32 %s1909_s17, 4  ;;  %s1816_s20 = int_to_ptr.vmem [resolvable:$false] %s1815_s20 }
  0x9a   : > { %s1817_s11 = scalar_lea.vmem %s1816_s20, 256  ;;  %p1818_p13 = scmp.lt.s32.totalorder %s291_s1, %s1816_s20 }
  0x9b   : > { %p1813_p11 = pnand %p1811_p9, %p2366_p0  ;;  %p1819_p2 = scmp.lt.s32.totalorder %s1817_s11, %s1810_s16 }
  0x9d   : > { %p1814_p4 = pneg %p1813_p11  ;;  %p1820_p7 = por %p1819_p2, %p1818_p13 }
  0x9f   : > { %p1821_p5 = pnand %p1820_p7, %p1814_p4 }
  0xa1   : > { %1824 = shalt.err (!%p1821_p5)
}
  0xa2   : > { %p2368_p12 = scmp.ne.s32.totalorder %s2359_s7, 0  ;;  %p2369_p3 = scmp.ne.s32.totalorder %s2352_s29, 0 }
  0xa3   : > { %s2183_s15 = sand.u32 (!%p2369_p3), 1, %s1891_s22   ;;  %p2370_p0 = scmp.ne.s32.totalorder (!%p2369_p3), %s2349_s27, 0 }
  0xa4   : > { %1616 = dma.hbm_to_vmem [thread:$0]  (!%p2368_p12), %s2159_s8, 128, %s291_s1, %s2079_s30  }
  0xa5   : > { %299 = sbr.rel (%p2369_p3) target bundleno = 606 (0x25e), region = 44  ;;  %s2186_s10 = sshll.u32 (!%p2369_p3), %s2183_s15, 3 }
  0xa6   : > { %s302_s28 = scalar_lea.sflag (!%p2369_p3), [#allocation4], %s2183_s15  ;;  %s305_s19 = scalar_lea.vmem (!%p2369_p3), [#allocation3], %s2186_s10 }
  0xac   : > { %1870 = dma.done.wait (%p2370_p0), %s302_s28, 128  }
  0xad   : > { %1872 = vsyncadd (%p2370_p0), %s302_s28, 4294967168  ;;  %s310_s29 = sand.u32 1, %s1977_s25   ;;  %s314_s30 = scalar_lea.vmem [#allocation6], %s2186_s10 }
  0xae   : > { %s311_s7 = scalar_lea.sflag [#allocation7], %s310_s29 }
  0xaf   : > { %1874 = dma.done.wait (%p2370_p0), %s311_s7, 256  }
  0xb0   : > { %1876 = vsyncadd (%p2370_p0), %s311_s7, 4294967040  ;;  %s323_s8 = scalar_lea.vmem [#allocation8], %s2186_s10  ;;  %p2371_p7 = scmp.eq.s32.totalorder %s1977_s25, 0 }
  0xb2   : > { %1878 = dma.done.wait (%p2371_p7), [#allocation10], 1088   ;;  %p2372_p1 = pmov %p2371_p7 }
  0xb3   : > { %v1910_v0 = vmov 0.0   ;;  %v382_v1 = vld [vmem:[%s323_s8] sm:$0xff]  ;;  %v376_v3 = vld [vmem:[%s314_s30] sm:$0xff]  ;;  %s1911_s27 = smov 127   ;;  %s1912_s12 = smov 16   ;;  %vm458_vm0 = vcmask 130048   ;;  %v402_v16 = vlaneseq }
  0xb4   : > { %1880 = vsyncadd (%p2372_p1), [#allocation10], 4294966208  ;;  %388 = vst [vmem:[#allocation2 + $0x10] sm:$0xf0] %v1910_v0  ;;  %892 = vmatprep.mubr.f32.mxu0 %v1910_v0  ;;  %526 = vmatprep.mubr.f32.mxu1 %v1910_v0  ;;  %v370_v2 = vld [vmem:[%s305_s19] sm:$0xff]  ;;  %v378_v4 = vcombine.low %v376_v3, %v376_v3  ;;  %v384_v6 = vcombine.high %v382_v1, %v382_v1  ;;  %s1913_s1 = smov 17  }
  0xb5   : > { %389 = vst [vmem:[#allocation2 + $0x18] sm:$0xf0] %v1910_v0  ;;  %386 = vst [vmem:[#allocation2 + $0x10] sm:$0xf] %v382_v1  ;;  %v372_v5 = vcombine.high %v370_v2, %v370_v2  ;;  %v824_v13 = vld [vmem:[#allocation9 + $0x10] sm:$0xf] }
  0xb6   : > { %374 = vst [vmem:[#allocation2] sm:$0xf] %v370_v2  ;;  %381 = vst [vmem:[#allocation2 + $0x8] sm:$0xf0] %v376_v3  ;;  %s1914_s9 = smov 113   ;;  %s1915_s26 = smov 15  }
  0xb7   : > { %380 = vst [vmem:[#allocation2] sm:$0xf0] %v378_v4  ;;  %375 = vst [vmem:[#allocation2 + $0x8] sm:$0xf] %v372_v5  ;;  %s1916_s3 = smov 112   ;;  %s1917_s24 = smov 1  }
  0xb8   : > { %387 = vst [vmem:[#allocation2 + $0x18] sm:$0xf] %v384_v6  ;;  %s1918_s18 = smov 111   ;;  %v1919_v14 = vmov 0   ;;  %v1333_v15 = vld [vmem:[%s2327_s4] sm:$0xf] }
  0xb9   : > { %1675 = vset.pattern.permute.xlu0 %v1919_v14  ;;  %v412_v19 = vshrl.u32 %v402_v16, 7  ;;  %v2214_v22 = vand.u32 127, %v402_v16  ;;  %v440_v25 = vld [vmem:[#allocation11 + $0x1] ss:$8 sm:$0x3]  ;;  %s1531_s17 = sshll.u32 %s1977_s25, 7 }
  0xba   : > { %v915_v29 = vld [vmem:[#allocation11 + $0x5] ss:$8 sm:$0x3]  ;;  %v409_v43 = vld [vmem:[#allocation11] ss:$8 sm:$0x3]  ;;  %s2279_s29 = scalar_lea.hbm %s2329_s6, %s1531_s17 }
  0xbb   : > { %v2216_v23 = vsub.s32 0, %v412_v19  ;;  %v2218_v24 = vsub.s32 1, %v412_v19  ;;  %vm434_vm1 = vcmp.lt.s32.totalorder %v2214_v22, 16  ;;  %vm909_vm2 = vcmp.lt.s32.totalorder %v2214_v22, 127  ;;  %v457_v62 = vld [vmem:[#allocation9 + $0x4] sm:$0xf] }
  0xbc   : > { %v392_v7 = vld [vmem:[#allocation2 + $0x10] sm:$0xff]  ;;  %vm404_vm3 = vcmp.lt.s32.totalorder %v2214_v22, 17  ;;  %vm1017_vm4 = vcmp.lt.s32.totalorder %v2214_v22, 113  ;;  %vm615_vm5 = vcmp.lt.s32.totalorder %v2214_v22, 15  ;;  %vm1125_vm6 = vcmp.lt.s32.totalorder %v2214_v22, 112  ;;  %s369_s20 = scalar_lea.vmem [#allocation12], %s2186_s10 }
  0xbd   : > { %903 = vrot.lane.b32.xlu1 %v392_v7, %s1911_s27  ;;  %428 = vrot.lane.b32.xlu0 %v392_v7, %s1912_s12  ;;  %v445_v28 = vrot.slane %v440_v25, %v2216_v23  ;;  %v449_v30 = vrot.slane %v440_v25, %v2218_v24  ;;  %v920_v35 = vrot.slane %v915_v29, %v2216_v23  ;;  %vm723_vm7 = vcmp.lt.s32.totalorder %v2214_v22, 1  ;;  %s1361_s11 = sshll.u32 %s369_s20, 4  ;;  %s1347_s7 = scalar_lea.sflag [#allocation5], %s2183_s15  ;;  %s2281_s11 = int_to_ptr.vmem [resolvable:$true] %s1361_s11 }
  0xbe   : > { %v390_v8 = vld [vmem:[#allocation2] sm:$0xff]  ;;  %v391_v9 = vld [vmem:[#allocation2 + $0x8] sm:$0xff]  ;;  %v924_v36 = vrot.slane %v915_v29, %v2218_v24  ;;  %v414_v52 = vrot.slane %v409_v43, %v2216_v23  ;;  %v418_v53 = vrot.slane %v409_v43, %v2218_v24  ;;  %vm1233_vm8 = vcmp.lt.s32.totalorder %v2214_v22, 111  ;;  %s1825_s30 = scalar_lea.vmem %s2281_s11, 128  ;;  %p2373_p10 = scmp.ne.s32.totalorder %s2358_s14, 0 }
  0xbf   : > { %v393_v10 = vld [vmem:[#allocation2 + $0x18] sm:$0xff]  ;;  %v1550_v12 = vpack.c.bf16 %v392_v7, %v390_v8  ;;  %p1826_p6 = scmp.ne.s32.totalorder %s2281_s11, %s1825_s30  ;;  %s1920_s25 = smov [#allocation12]  }
  0xc0   : > { %v1548_v11 = vpack.c.bf16 %v393_v10, %v391_v9  ;;  %s1829_s10 = sshll.u32 %s1920_s25, 4  ;;  %s1830_s10 = int_to_ptr.vmem [resolvable:$false] %s1829_s10 }
  0xc1   : > { %396 = vrot.lane.b32.xlu1 %v392_v7, %s1913_s1  ;;  %426 = vrot.lane.b32.xlu0 %v390_v8, %s1912_s12  ;;  %p1827_p8 = pnand %p1826_p6, %p2373_p10  ;;  %s1831_s8 = scalar_lea.vmem %s1830_s10, 256 }
  0xc2   : > { %1549 = vmatprep.subr.bf16.mxu0 %v1548_v11  ;;  %p1832_p11 = scmp.lt.s32.totalorder %s2281_s11, %s1830_s10  ;;  %p1833_p4 = scmp.lt.s32.totalorder %s1831_s8, %s1825_s30 }
  0xc3   : > { %1551 = vmatpush1.bf16.msra.mxu0 %v1550_v12  ;;  %p1828_p9 = pneg %p1827_p8 }
  0xc4   : > { %p1834_p13 = por %p1833_p4, %p1832_p11 }
  0xc5   : > { %901 = vrot.lane.b32.xlu0 %v390_v8, %s1911_s27  ;;  %430 = vrot.lane.b32.xlu1 %v391_v9, %s1912_s12 }
  0xc6   : > { %1518 = vmatmul.mubr.msk.f32.vlgmr.msra.gmra.mrb[0].mxu0 %vm458_vm0, %v824_v13  ;;  %p1835_p2 = pnand %p1834_p13, %p1828_p9 }
  0xc7   : > { %1000 = vmatprep.mubr.f32.mxu0 %v1910_v0 }
  0xc9   : > { %905 = vrot.lane.b32.xlu0 %v391_v9, %s1911_s27  ;;  %432 = vrot.lane.b32.xlu1 %v393_v10, %s1912_s12 }
  0xcd   : > { %394 = vrot.lane.b32.xlu0 %v390_v8, %s1913_s1  ;;  %907 = vrot.lane.b32.xlu1 %v393_v10, %s1911_s27 }
  0xd1   : > { %398 = vrot.lane.b32.xlu0 %v391_v9, %s1913_s1  ;;  %400 = vrot.lane.b32.xlu1 %v393_v10, %s1913_s1 }
  0xd5   : > { %1009 = vrot.lane.b32.xlu0 %v390_v8, %s1914_s9  ;;  %1011 = vrot.lane.b32.xlu1 %v392_v7, %s1914_s9 }
  0xd9   : > { %1013 = vrot.lane.b32.xlu0 %v391_v9, %s1914_s9  ;;  %1015 = vrot.lane.b32.xlu1 %v393_v10, %s1914_s9 }
  0xdd   : > { %607 = vrot.lane.b32.xlu0 %v390_v8, %s1915_s26  ;;  %609 = vrot.lane.b32.xlu1 %v392_v7, %s1915_s26 }
  0xe1   : > { %611 = vrot.lane.b32.xlu0 %v391_v9, %s1915_s26  ;;  %613 = vrot.lane.b32.xlu1 %v393_v10, %s1915_s26 }
  0xe5   : > { %1117 = vrot.lane.b32.xlu0 %v390_v8, %s1916_s3  ;;  %1119 = vrot.lane.b32.xlu1 %v392_v7, %s1916_s3 }
  0xe9   : > { %1121 = vrot.lane.b32.xlu0 %v391_v9, %s1916_s3  ;;  %1123 = vrot.lane.b32.xlu1 %v393_v10, %s1916_s3 }
  0xed   : > { %715 = vrot.lane.b32.xlu0 %v390_v8, %s1917_s24  ;;  %717 = vrot.lane.b32.xlu1 %v392_v7, %s1917_s24 }
  0xf1   : > { %719 = vrot.lane.b32.xlu0 %v391_v9, %s1917_s24  ;;  %721 = vrot.lane.b32.xlu1 %v393_v10, %s1917_s24 }
  0xf5   : > { %1225 = vrot.lane.b32.xlu0 %v390_v8, %s1918_s18  ;;  %1227 = vrot.lane.b32.xlu1 %v392_v7, %s1918_s18  ;;  %v1023_v8 = vld [vmem:[#allocation11 + $0x6] ss:$8 sm:$0x3] }
  0xf6   : > { %v1028_v14 = vrot.slane %v1023_v8, %v2216_v23 }
  0xf9   : > { %1229 = vrot.lane.b32.xlu0 %v391_v9, %s1918_s18  ;;  %1231 = vrot.lane.b32.xlu1 %v393_v10, %s1918_s18  ;;  %v932_v9 = vld [vmem:[#allocation9 + $0x14] sm:$0xf] }
  0xfd   : > { %1336 = vperm.xlu0 %1675, %v1333_v15   ;;  %v1032_v15 = vrot.slane %v1023_v8, %v2218_v24 }
 0x12f   : > { %v904_v17 = vpop.permute.xlu1 %903  ;;  %v429_v18 = vpop.permute.xlu0 %428 }
 0x133   : > { %v397_v20 = vpop.permute.xlu1 %396  ;;  %v427_v21 = vpop.permute.xlu0 %426 }
 0x137   : > { %v902_v26 = vpop.permute.xlu0 %901  ;;  %v431_v27 = vpop.permute.xlu1 %430 }
 0x138   : > { %v435_v31 = vsel %vm434_vm1, %v427_v21, %v431_v27  ;;  %v437_v32 = vsel %vm434_vm1, %v431_v27, %v427_v21 }
 0x139   : > { %v452_v39 = vmul.f32 %v445_v28, %v437_v32  ;;  %v453_v41 = vmul.f32 %v449_v30, %v435_v31 }
 0x13b   : > { %v906_v33 = vpop.permute.xlu0 %905  ;;  %v433_v34 = vpop.permute.xlu1 %432 }
 0x13c   : > { %v436_v37 = vsel %vm434_vm1, %v429_v18, %v433_v34  ;;  %v438_v38 = vsel %vm434_vm1, %v433_v34, %v429_v18  ;;  %v910_v44 = vsel %vm909_vm2, %v902_v26, %v906_v33  ;;  %v912_v45 = vsel %vm909_vm2, %v906_v33, %v902_v26  ;;  %v425_v18 = vld [vmem:[#allocation9] sm:$0xf] }
 0x13d   : > { %v454_v40 = vmul.f32 %v445_v28, %v438_v38  ;;  %v455_v42 = vmul.f32 %v449_v30, %v436_v37  ;;  %v927_v54 = vmul.f32 %v920_v35, %v910_v44  ;;  %v928_v55 = vmul.f32 %v924_v36, %v912_v45  ;;  %v621_v30 = vld [vmem:[#allocation11 + $0x2] ss:$8 sm:$0x3]  ;;  %v1040_v37 = vld [vmem:[#allocation9 + $0x18] sm:$0xf] }
 0x13f   : > { %v395_v46 = vpop.permute.xlu0 %394  ;;  %v908_v47 = vpop.permute.xlu1 %907  ;;  %v1532_v48 = vpack.c.bf16 %v455_v42, %v453_v41  ;;  %v1534_v49 = vpack.c.bf16 %v454_v40, %v452_v39 }
 0x140   : > { %v911_v50 = vsel %vm909_vm2, %v904_v17, %v908_v47  ;;  %v913_v51 = vsel %vm909_vm2, %v908_v47, %v904_v17 }
 0x141   : > { %v929_v56 = vmul.f32 %v920_v35, %v911_v50  ;;  %v930_v57 = vmul.f32 %v924_v36, %v913_v51  ;;  %1533 = vmatprep.subr.bf16.mxu1 %v1532_v48  ;;  %v626_v35 = vrot.slane %v621_v30, %v2216_v23  ;;  %v630_v36 = vrot.slane %v621_v30, %v2218_v24  ;;  %v1131_v48 = vld [vmem:[#allocation11 + $0x7] ss:$8 sm:$0x3] }
 0x142   : > { %1535 = vmatpush1.bf16.msra.mxu1 %v1534_v49 }
 0x143   : > { %v1554_v58 = vpack.c.bf16 %v929_v56, %v927_v54  ;;  %v399_v59 = vpop.permute.xlu0 %398  ;;  %v401_v60 = vpop.permute.xlu1 %400  ;;  %v1552_v61 = vpack.c.bf16 %v930_v57, %v928_v55  ;;  %v1140_v54 = vrot.slane %v1131_v48, %v2218_v24  ;;  %v638_v55 = vld [vmem:[#allocation9 + $0x8] sm:$0xf] }
 0x144   : > { %v405_v63 = vsel %vm404_vm3, %v395_v46, %v399_v59  ;;  %v407_v1 = vsel %vm404_vm3, %v399_v59, %v395_v46  ;;  %v406_v2 = vsel %vm404_vm3, %v397_v20, %v401_v60  ;;  %v408_v3 = vsel %vm404_vm3, %v401_v60, %v397_v20 }
 0x145   : > { %v421_v4 = vmul.f32 %v414_v52, %v407_v1  ;;  %v422_v5 = vmul.f32 %v418_v53, %v405_v63  ;;  %v423_v6 = vmul.f32 %v414_v52, %v408_v3  ;;  %v424_v7 = vmul.f32 %v418_v53, %v406_v2  ;;  %1553 = vmatprep.subr.bf16.mxu0 %v1552_v61  ;;  %v729_v3 = vld [vmem:[#allocation11 + $0x3] ss:$8 sm:$0x3] }
 0x146   : > { %1555 = vmatpush1.bf16.msra.mxu0 %v1554_v58  ;;  %1514 = vmatmul.mubr.msk.f32.vlgmr.msra.gmra.mrb[0].mxu1 %vm458_vm0, %v457_v62  ;;  %v1136_v53 = vrot.slane %v1131_v48, %v2216_v23  ;;  %v734_v8 = vrot.slane %v729_v3, %v2216_v23 }
 0x147   : > { %v1538_v10 = vpack.c.bf16 %v423_v6, %v421_v4  ;;  %v1010_v11 = vpop.permute.xlu0 %1009  ;;  %v1012_v12 = vpop.permute.xlu1 %1011  ;;  %v1536_v13 = vpack.c.bf16 %v424_v7, %v422_v5  ;;  %600 = vmatprep.mubr.f32.mxu1 %v1910_v0 }
 0x149   : > { %1537 = vmatprep.subr.bf16.mxu1 %v1536_v13  ;;  %1519 = vmatmul.mubr.msk.f32.vlgmr.msra.gmra.mrb[0].mxu0 %vm458_vm0, %v932_v9  ;;  %v738_v9 = vrot.slane %v729_v3, %v2218_v24 }
 0x14a   : > { %1539 = vmatpush1.bf16.msra.mxu1 %v1538_v10  ;;  %1108 = vmatprep.mubr.f32.mxu0 %v1910_v0  ;;  %v1148_v10 = vld [vmem:[#allocation9 + $0x1c] sm:$0xf] }
 0x14b   : > { %v1014_v16 = vpop.permute.xlu0 %1013  ;;  %v1016_v17 = vpop.permute.xlu1 %1015 }
 0x14c   : > { %v1018_v19 = vsel %vm1017_vm4, %v1010_v11, %v1014_v16  ;;  %v1020_v20 = vsel %vm1017_vm4, %v1014_v16, %v1010_v11  ;;  %v1019_v21 = vsel %vm1017_vm4, %v1012_v12, %v1016_v17  ;;  %v1021_v25 = vsel %vm1017_vm4, %v1016_v17, %v1012_v12 }
 0x14d   : > { %v1035_v26 = vmul.f32 %v1028_v14, %v1018_v19  ;;  %v1036_v27 = vmul.f32 %v1032_v15, %v1020_v20  ;;  %v1037_v28 = vmul.f32 %v1028_v14, %v1019_v21  ;;  %v1038_v29 = vmul.f32 %v1032_v15, %v1021_v25  ;;  %v1239_v21 = vld [vmem:[#allocation11 + $0x10] ss:$8 sm:$0x3] }
 0x14e   : > { %1515 = vmatmul.mubr.msk.f32.vlgmr.msra.gmra.mrb[0].mxu1 %vm458_vm0, %v425_v18  ;;  %v1248_v30 = vrot.slane %v1239_v21, %v2218_v24  ;;  %v1256_v24 = vld [vmem:[#allocation9 + $0x20] sm:$0xf] }
 0x14f   : > { %v1558_v31 = vpack.c.bf16 %v1037_v28, %v1035_v26  ;;  %v608_v32 = vpop.permute.xlu0 %607  ;;  %v610_v33 = vpop.permute.xlu1 %609  ;;  %v1556_v34 = vpack.c.bf16 %v1038_v29, %v1036_v27  ;;  %706 = vmatprep.mubr.f32.mxu1 %v1910_v0  ;;  %v1244_v29 = vrot.slane %v1239_v21, %v2216_v23 }
 0x151   : > { %1557 = vmatprep.subr.bf16.mxu0 %v1556_v34 }
 0x152   : > { %1559 = vmatpush1.bf16.msra.mxu0 %v1558_v31  ;;  %v746_v31 = vld [vmem:[#allocation9 + $0xc] sm:$0xf] }
 0x153   : > { %v612_v38 = vpop.permute.xlu0 %611  ;;  %v614_v39 = vpop.permute.xlu1 %613 }
 0x154   : > { %v616_v40 = vsel %vm615_vm5, %v608_v32, %v612_v38  ;;  %v618_v41 = vsel %vm615_vm5, %v612_v38, %v608_v32  ;;  %v617_v42 = vsel %vm615_vm5, %v610_v33, %v614_v39  ;;  %v619_v43 = vsel %vm615_vm5, %v614_v39, %v610_v33 }
 0x155   : > { %v633_v44 = vmul.f32 %v626_v35, %v618_v41  ;;  %v634_v45 = vmul.f32 %v630_v36, %v616_v40  ;;  %v635_v46 = vmul.f32 %v626_v35, %v619_v43  ;;  %v636_v47 = vmul.f32 %v630_v36, %v617_v42  ;;  %1520 = vmatmul.mubr.msk.f32.vlgmr.msra.gmra.mrb[0].mxu0 %vm458_vm0, %v1040_v37 }
 0x156   : > { %1216 = vmatprep.mubr.f32.mxu0 %v1910_v0 }
 0x157   : > { %v1542_v49 = vpack.c.bf16 %v635_v46, %v633_v44  ;;  %v1118_v50 = vpop.permute.xlu0 %1117  ;;  %v1120_v51 = vpop.permute.xlu1 %1119  ;;  %v1540_v52 = vpack.c.bf16 %v636_v47, %v634_v45 }
 0x159   : > { %1541 = vmatprep.subr.bf16.mxu1 %v1540_v52 }
 0x15a   : > { %1543 = vmatpush1.bf16.msra.mxu1 %v1542_v49 }
 0x15b   : > { %v1122_v56 = vpop.permute.xlu0 %1121  ;;  %v1124_v57 = vpop.permute.xlu1 %1123 }
 0x15c   : > { %v1126_v58 = vsel %vm1125_vm6, %v1118_v50, %v1122_v56  ;;  %v1128_v59 = vsel %vm1125_vm6, %v1122_v56, %v1118_v50  ;;  %v1127_v60 = vsel %vm1125_vm6, %v1120_v51, %v1124_v57  ;;  %v1129_v61 = vsel %vm1125_vm6, %v1124_v57, %v1120_v51 }
 0x15d   : > { %v1143_v62 = vmul.f32 %v1136_v53, %v1126_v58  ;;  %v1144_v63 = vmul.f32 %v1140_v54, %v1128_v59  ;;  %v1145_v1 = vmul.f32 %v1136_v53, %v1127_v60  ;;  %v1146_v2 = vmul.f32 %v1140_v54, %v1129_v61  ;;  %1516 = vmatmul.mubr.msk.f32.vlgmr.msra.gmra.mrb[0].mxu1 %vm458_vm0, %v638_v55 }
 0x15e   : > { %814 = vmatprep.mubr.f32.mxu1 %v1910_v0 }
 0x15f   : > { %v1562_v4 = vpack.c.bf16 %v1145_v1, %v1143_v62  ;;  %v716_v5 = vpop.permute.xlu0 %715  ;;  %v718_v6 = vpop.permute.xlu1 %717  ;;  %v1560_v7 = vpack.c.bf16 %v1146_v2, %v1144_v63 }
 0x161   : > { %1561 = vmatprep.subr.bf16.mxu0 %v1560_v7 }
 0x162   : > { %1563 = vmatpush1.bf16.msra.mxu0 %v1562_v4 }
 0x163   : > { %v720_v11 = vpop.permute.xlu0 %719  ;;  %v722_v12 = vpop.permute.xlu1 %721 }
 0x164   : > { %v724_v13 = vsel %vm723_vm7, %v716_v5, %v720_v11  ;;  %v726_v14 = vsel %vm723_vm7, %v720_v11, %v716_v5  ;;  %v725_v15 = vsel %vm723_vm7, %v718_v6, %v722_v12  ;;  %v727_v16 = vsel %vm723_vm7, %v722_v12, %v718_v6 }
 0x165   : > { %v741_v17 = vmul.f32 %v734_v8, %v726_v14  ;;  %v742_v18 = vmul.f32 %v738_v9, %v724_v13  ;;  %v743_v19 = vmul.f32 %v734_v8, %v727_v16  ;;  %v744_v20 = vmul.f32 %v738_v9, %v725_v15  ;;  %1521 = vmatmul.mubr.msk.f32.vlgmr.msra.gmra.mrb[0].mxu0 %vm458_vm0, %v1148_v10 }
 0x166   : > { %1324 = vmatprep.mubr.f32.mxu0 %v1910_v0 }
 0x167   : > { %v1546_v25 = vpack.c.bf16 %v743_v19, %v741_v17  ;;  %v1226_v26 = vpop.permute.xlu0 %1225  ;;  %v1228_v27 = vpop.permute.xlu1 %1227  ;;  %v1544_v28 = vpack.c.bf16 %v744_v20, %v742_v18 }
 0x169   : > { %1545 = vmatprep.subr.bf16.mxu1 %v1544_v28 }
 0x16a   : > { %1547 = vmatpush1.bf16.msra.mxu1 %v1546_v25 }
 0x16b   : > { %v1230_v32 = vpop.permute.xlu0 %1229  ;;  %v1232_v33 = vpop.permute.xlu1 %1231 }
 0x16c   : > { %v1234_v34 = vsel %vm1233_vm8, %v1226_v26, %v1230_v32  ;;  %v1236_v35 = vsel %vm1233_vm8, %v1230_v32, %v1226_v26  ;;  %v1235_v36 = vsel %vm1233_vm8, %v1228_v27, %v1232_v33  ;;  %v1237_v37 = vsel %vm1233_vm8, %v1232_v33, %v1228_v27 }
 0x16d   : > { %v1251_v0 = vmul.f32 %v1244_v29, %v1234_v34  ;;  %v1252_v38 = vmul.f32 %v1248_v30, %v1236_v35  ;;  %v1253_v39 = vmul.f32 %v1244_v29, %v1235_v36  ;;  %v1254_v40 = vmul.f32 %v1248_v30, %v1237_v37  ;;  %1517 = vmatmul.mubr.msk.f32.vlgmr.msra.gmra.mrb[0].mxu1 %vm458_vm0, %v746_v31 }
 0x16f   : > { %v1566_v22 = vpack.c.bf16 %v1253_v39, %v1251_v0  ;;  %v1564_v23 = vpack.c.bf16 %v1254_v40, %v1252_v38 }
 0x171   : > { %1565 = vmatprep.subr.bf16.mxu0 %v1564_v23 }
 0x172   : > { %1567 = vmatpush1.bf16.msra.mxu0 %v1566_v22 }
 0x175   : > { %1522 = vmatmul.mubr.msk.f32.vlgmr.msra.gmra.mrb[0].mxu0 %vm458_vm0, %v1256_v24 }
 0x17c   : > { %v1337_v44 = vpop.permute.xlu0 %1336 }
 0x240   : > { %v816_v41 = vpop.f32.mrb[0].mxu1 }
 0x241   : > { %v818_v42 = vpop.f32.mrb[1].mxu1 }
 0x248   : > { %v1326_v43 = vpop.f32.mrb[0].mxu0 }
 0x249   : > { %v1568_v45 = vadd.f32 %v1326_v43, %v816_v41  ;;  %v1328_v46 = vpop.f32.mrb[1].mxu0 }
 0x24a   : > { %v1569_v47 = vadd.f32 %v1328_v46, %v818_v42 }
 0x24b   : > { %v1339_v48 = vadd.f32 %v1568_v45, %v1337_v44 }
 0x24c   : > { %v1340_v49 = vadd.f32 %v1569_v47, %v1337_v44 }
 0x24e   : > { %v1343_v50 = vcombine.low %v1339_v48, %v1340_v49 }
 0x250   : > { %1345 = vst [vmem:[%s369_s20] sm:$0xff] %v1343_v50 }
 0x251   : > { %1838 = shalt.err (!%p1835_p2)
}
 0x252   : > { %s1839_s15 = scalar_lea.hbm %s2279_s29, 128  ;;  %s1843_s1 = scalar_lea.hbm %s2329_s6, 256 }
 0x253   : > { %p1840_p5 = scmp.ne.s32.totalorder %s2279_s29, %s1839_s15  ;;  %p1844_p0 = scmp.lt.u32.totalorder %s2279_s29, %s2329_s6 }
 0x254   : > { %p1845_p7 = scmp.lt.u32.totalorder %s1843_s1, %s1839_s15  ;;  %p1847_p6 = scmp.lt.u32.totalorder %s1839_s15, %s2279_s29 }
 0x255   : > { %p1841_p12 = pnand %p1840_p5, %p2373_p10 }
 0x256   : > { %p1846_p1 = por %p1845_p7, %p1844_p0 }
 0x257   : > { %p1842_p3 = pneg %p1841_p12 }
 0x258   : > { %p1848_p8 = por %p1847_p6, %p1846_p1 }
 0x25a   : > { %p1849_p9 = pnand %p1848_p8, %p1842_p3 }
 0x25c   : > { %1852 = shalt.err (!%p1849_p9)
}
 0x25d   : > { %1598 = dma.vmem_to_hbm [thread:$0]  (%p2373_p10), %s2281_s11, 128, %s2279_s29, %s1347_s7  }
 0x25e PF: > { %s2374_s3 = sld [smem:[#allocation18_spill]]  ;;  %s2375_s24 = sld [smem:[#allocation17_spill]] }
 0x25f   : > { %s1373_s18 = sand.u32 1, %s1887_s21  }
 0x260   : > { %s1374_s13 = scalar_lea.sflag [#allocation5], %s1373_s18 }
 0x264   : > { %p2376_p11 = scmp.ne.s32.totalorder %s2374_s3, 0  ;;  %p2377_p4 = scmp.ge.s32.totalorder %s2375_s24, 2 }
 0x266   : > { %p1618_p13 = pnand %p2377_p4, %p2376_p11 }
 0x268   : > { %1882 = dma.done.wait (!%p1618_p13), %s1374_s13, 128  }
 0x269   : > { %1884 = vsyncadd (!%p1618_p13), %s1374_s13, 4294967168  ;;  %s2378_s24 = sld [smem:[#allocation19_spill]]  ;;  %s2379_s16 = sld [smem:[#allocation20_spill]] }
 0x26a   : > { %s2380_s21 = smov %s1891_s22  ;;  %s2381_s22 = smov %s1895_s23 }
 0x26f   : > { %p23_p2 = scmp.ge.s32.totalorder %s2378_s24, 4   ;;  %s2382_s23 = smov %s2379_s16 }
 0x271   :  { %25 = sbr.rel (!%p23_p2) target bundleno = 11 (0xb), region = 136 }
 0x278   :  { %1379 = vsyncpa [#allocation4], 1 }
 0x279   :  { %1381 = vsyncpa [#allocation4 + $0x1], 1 }
 0x27a   :  { %1382 = vsyncpa [#allocation7], 1 }
 0x27b   :  { %1384 = vsyncpa [#allocation7 + $0x1], 1 }
 0x27c   :  { %1385 = vsyncpa [#allocation10], 1 }
 0x27d   :  { %1386 = vsyncpa [#allocation5], 1 }
 0x27e   :  { %1388 = vsyncpa [#allocation5 + $0x1], 1 }

</bundles_post_ra>
